<compile_context>
chip_gen: v5e
topology: v5e:2x2
jax: 0.10.0
libtpu: 0.0.40
codegen_flags: <defaults>
</compile_context>

<pallas_src>
import functools
import math

import jax
import jax.numpy as jnp
from jax.experimental import pallas as pl
from jax.experimental.pallas import tpu as pltpu

_VMEM_LIMIT_BYTES = 32 * 1024 * 1024  # > v5e 16 MiB default, safe on v7x (64 MiB phys)


# ---------------------------------------------------------------------------
# Tiling helpers
# ---------------------------------------------------------------------------

def _sublane_granule(dtype) -> int:
    """Minimum second-to-last-dim granularity for this dtype (8 f32, 16 bf16, 32 i8)."""
    itemsize = jnp.dtype(dtype).itemsize
    return max(8, 32 // max(itemsize, 1))


def _pick_row_tile(dim: int, preferred: int, granule: int) -> int:
    """Largest tile <= `preferred` that is a multiple of `granule` AND divides `dim`
    evenly, so the grid has no partial blocks and no host-side padding is needed.
    Falls back to the full dimension for small / non-aligned sizes."""
    if dim <= preferred:
        return dim
    if dim % granule != 0:
        return dim
    t = (preferred // granule) * granule
    while t >= granule:
        if dim % t == 0:
            return t
        t -= granule
    return dim


# ---------------------------------------------------------------------------
# Linear projection: y = x @ W^T + b   (PyTorch nn.Linear semantics)
# ---------------------------------------------------------------------------

def _linear_kernel(x_ref, wt_ref, b_ref, o_ref):
    y = jnp.dot(x_ref[...], wt_ref[...], preferred_element_type=jnp.float32)
    o_ref[...] = (y + b_ref[...]).astype(o_ref.dtype)


def linear(x, weight, bias, *, block_rows=512):
    """x: (rows, d_in), weight: (d_out, d_in) torch-style, bias: (d_out,)."""
    rows, d_in = x.shape
    d_out = weight.shape[0]

    # Pre-cast / pre-transpose once in the wrapper (not per grid step).
    wt = jnp.asarray(weight, jnp.float32).T            # (d_in, d_out)
    b = jnp.asarray(bias, jnp.float32).reshape(1, d_out)

    tr = _pick_row_tile(rows, block_rows, _sublane_granule(x.dtype))
    grid = (rows // tr,)

    itemsize = jnp.dtype(x.dtype).itemsize
    cost = pl.CostEstimate(
        flops=2 * rows * d_in * d_out,
        transcendentals=0,
        bytes_accessed=int(rows * d_in * itemsize + (d_in + 1) * d_out * 4
                           + rows * d_out * itemsize),
    )

    return pl.pallas_call(
        _linear_kernel,
        out_shape=jax.ShapeDtypeStruct((rows, d_out), x.dtype),
        grid_spec=pltpu.PrefetchScalarGridSpec(
            num_scalar_prefetch=0,
            grid=grid,
            in_specs=[
                pl.BlockSpec((tr, d_in), lambda i: (i, 0)),
                pl.BlockSpec((d_in, d_out), lambda i: (0, 0)),   # resident
                pl.BlockSpec((1, d_out), lambda i: (0, 0)),      # resident
            ],
            out_specs=pl.BlockSpec((tr, d_out), lambda i: (i, 0)),
        ),
        compiler_params=pltpu.CompilerParams(
            dimension_semantics=("parallel",),
            vmem_limit_bytes=_VMEM_LIMIT_BYTES,
        ),
        cost_estimate=cost,
    )(x, wt, b)


# ---------------------------------------------------------------------------
# Fused attention core: (softmax(Q K^T) / sqrt(hidden)) @ V
# ---------------------------------------------------------------------------

def _attention_kernel(q_ref, k_ref, v_ref, o_ref, m_sc, l_sc, acc_sc, *, scale):
    kv = pl.program_id(1)

    @pl.when(kv == 0)
    def _():
        m_sc[...] = jnp.full_like(m_sc, -jnp.inf)
        l_sc[...] = jnp.zeros_like(l_sc)
        acc_sc[...] = jnp.zeros_like(acc_sc)

    q = q_ref[...].astype(jnp.float32)
    k = k_ref[...].astype(jnp.float32)
    # scores (tq, tk): contract over the hidden axis of Q and K.
    s = jax.lax.dot_general(q, k, (((1,), (1,)), ((), ())),
                            preferred_element_type=jnp.float32)

    m_prev = m_sc[...]
    m_new = jnp.maximum(m_prev, jnp.max(s, axis=-1, keepdims=True))
    alpha = jnp.exp(m_prev - m_new)
    p = jnp.exp(s - m_new)

    l_sc[...] = alpha * l_sc[...] + jnp.sum(p, axis=-1, keepdims=True)
    acc_sc[...] = alpha * acc_sc[...] + jnp.dot(
        p.astype(v_ref.dtype), v_ref[...], preferred_element_type=jnp.float32)
    m_sc[...] = m_new

    @pl.when(kv == pl.num_programs(1) - 1)
    def _():
        # The reference module divides by sqrt(hidden) AFTER the softmax, so the
        # scale can be folded into the normalization at finalize time.
        o_ref[...] = (acc_sc[...] * (scale / l_sc[...])).astype(o_ref.dtype)


def attention_core(lq, lk, lv, hidden_dim, *, q_block=256, kv_block=512):
    n, h = lq.shape
    m, o = lv.shape
    assert lk.shape == (m, h)

    tq = _pick_row_tile(n, q_block, _sublane_granule(lq.dtype))
    tk = _pick_row_tile(m, kv_block, _sublane_granule(lk.dtype))
    grid = (n // tq, m // tk)

    scale = 1.0 / math.sqrt(hidden_dim)
    kernel = functools.partial(_attention_kernel, scale=scale)

    itemsize = jnp.dtype(lq.dtype).itemsize
    cost = pl.CostEstimate(
        flops=2 * n * m * h + 2 * n * m * o,
        transcendentals=n * m,
        bytes_accessed=int((n * h + m * h + m * o + n * o) * itemsize),
    )

    return pl.pallas_call(
        kernel,
        out_shape=jax.ShapeDtypeStruct((n, o), lq.dtype),
        grid_spec=pltpu.PrefetchScalarGridSpec(
            num_scalar_prefetch=0,
            grid=grid,
            in_specs=[
                pl.BlockSpec((tq, h), lambda qi, ki: (qi, 0)),
                pl.BlockSpec((tk, h), lambda qi, ki: (ki, 0)),
                pl.BlockSpec((tk, o), lambda qi, ki: (ki, 0)),
            ],
            out_specs=pl.BlockSpec((tq, o), lambda qi, ki: (qi, 0)),
            scratch_shapes=[
                pltpu.VMEM((tq, 1), jnp.float32),   # running max
                pltpu.VMEM((tq, 1), jnp.float32),   # running denom
                pltpu.VMEM((tq, o), jnp.float32),   # output accumulator
            ],
        ),
        compiler_params=pltpu.CompilerParams(
            dimension_semantics=("parallel", "arbitrary"),
            vmem_limit_bytes=_VMEM_LIMIT_BYTES,
        ),
        cost_estimate=cost,
    )(lq, lk, lv)


# ---------------------------------------------------------------------------
# Full module forward
# ---------------------------------------------------------------------------

def qkv_attention_forward(input_query, input_key, input_value, params, hidden_dim):
    lq = linear(input_query, params["wq"], params["bq"])
    lk = linear(input_key, params["wk"], params["bk"])
    lv = linear(input_value, params["wv"], params["bv"])
    out = attention_core(lq, lk, lv, hidden_dim)
    # TODO(synk): nn.Dropout is identity in eval/inference mode; training-mode
    # dropout (pltpu.prng_seed + pltpu.stateful_bernoulli) is not implemented.
    return out


def qkv_attention_ref(input_query, input_key, input_value, params, hidden_dim):
    lq = input_query @ params["wq"].T + params["bq"]
    lk = input_key @ params["wk"].T + params["bk"]
    lv = input_value @ params["wv"].T + params["bv"]
    score = jax.nn.softmax(lq @ lk.T, axis=-1) / math.sqrt(hidden_dim)
    return score @ lv


if __name__ == "__main__":
    key = jax.random.PRNGKey(0)
    n, m = 8, 16
    query_dim, key_dim, value_dim = 32, 48, 40
    hidden_dim, output_dim = 64, 32

    ks = jax.random.split(key, 9)
    input_query = jax.random.normal(ks[0], (n, query_dim), jnp.float32)
    input_key = jax.random.normal(ks[1], (m, key_dim), jnp.float32)
    input_value = jax.random.normal(ks[2], (m, value_dim), jnp.float32)

    def init_linear(kw, kb, d_out, d_in):
        bound = 1.0 / math.sqrt(d_in)        # torch nn.Linear default init range
        w = jax.random.uniform(kw, (d_out, d_in), jnp.float32, -bound, bound)
        b = jax.random.uniform(kb, (d_out,), jnp.float32, -bound, bound)
        return w, b

    wq, bq = init_linear(ks[3], ks[4], hidden_dim, query_dim)
    wk, bk = init_linear(ks[5], ks[6], hidden_dim, key_dim)
    wv, bv = init_linear(ks[7], ks[8], output_dim, value_dim)
    params = dict(wq=wq, bq=bq, wk=wk, bk=bk, wv=wv, bv=bv)

    out = qkv_attention_forward(input_query, input_key, input_value, params, hidden_dim)
    out = jax.block_until_ready(out)

    ref = qkv_attention_ref(input_query, input_key, input_value, params, hidden_dim)
    assert out.shape == (n, output_dim)
    assert jnp.allclose(out, ref, atol=1e-4, rtol=1e-4), "mismatch vs reference"

    print("KERNEL_OK")
</pallas_src>

<mosaic_0001>
module attributes {stable_mosaic.version = 11 : i64} {
  func.func @_linear_kernel(%arg0: i32, %arg1: memref<8x32xf32, #tpu.memory_space<vmem>>, %arg2: memref<32x64xf32, #tpu.memory_space<vmem>>, %arg3: memref<1x64xf32, #tpu.memory_space<vmem>>, %arg4: memref<8x64xf32, #tpu.memory_space<vmem>>) attributes {dimension_semantics = [#tpu.dimension_semantics<parallel>], iteration_bounds = array<i64: 1>, scalar_prefetch = 0 : i64, scratch_operands = 0 : i64, tpu.core_type = #tpu.core_type<tc>, window_params = [{transform_indices = @transform_0, window_bounds = array<i64: 8, 32>}, {pipeline_mode = #tpu.pipeline_mode<synchronous>, transform_indices = @transform_1, window_bounds = array<i64: 32, 64>}, {pipeline_mode = #tpu.pipeline_mode<synchronous>, transform_indices = @transform_2, window_bounds = array<i64: 1, 64>}, {transform_indices = @transform_3, window_bounds = array<i64: 8, 64>}]} {
    %c0 = arith.constant 0 : index
    %c0_0 = arith.constant 0 : index
    %0 = vector.load %arg1[%c0, %c0_0] : memref<8x32xf32, #tpu.memory_space<vmem>>, vector<8x32xf32>
    %c0_1 = arith.constant 0 : index
    %c0_2 = arith.constant 0 : index
    %1 = vector.load %arg2[%c0_1, %c0_2] : memref<32x64xf32, #tpu.memory_space<vmem>>, vector<32x64xf32>
    %cst = arith.constant dense<0.000000e+00> : vector<8x64xf32>
    %2 = tpu.matmul %0, %1, %cst {dimension_numbers = #tpu.dot_dimension_numbers<[1], [0], [0], [1], [0, 0, 1, 1], [], []>} : vector<8x32xf32>, vector<32x64xf32>, vector<8x64xf32> -> vector<8x64xf32>
    %c0_3 = arith.constant 0 : index
    %c0_4 = arith.constant 0 : index
    %3 = vector.load %arg3[%c0_3, %c0_4] : memref<1x64xf32, #tpu.memory_space<vmem>>, vector<1x64xf32>
    %4 = vector.broadcast %3 : vector<1x64xf32> to vector<8x64xf32>
    %5 = arith.addf %2, %4 : vector<8x64xf32>
    %c0_5 = arith.constant 0 : index
    %c0_6 = arith.constant 0 : index
    %6 = vector.load %arg4[%c0_5, %c0_6] : memref<8x64xf32, #tpu.memory_space<vmem>>, vector<8x64xf32>
    tpu.vector_store %arg4[%c0_5, %c0_6], %5 {strides = array<i32>} : memref<8x64xf32, #tpu.memory_space<vmem>>, vector<8x64xf32>,
    return
  }
  func.func @transform_0(%arg0: i32) -> (i32, i32) {
    %c0_i32 = arith.constant 0 : i32
    %c0_i32_0 = arith.constant 0 : i32
    return %arg0, %c0_i32 : i32, i32
  }
  func.func @transform_1(%arg0: i32) -> (i32, i32) {
    %c0_i32 = arith.constant 0 : i32
    %c0_i32_0 = arith.constant 0 : i32
    %c0_i32_1 = arith.constant 0 : i32
    return %c0_i32, %c0_i32_0 : i32, i32
  }
  func.func @transform_2(%arg0: i32) -> (i32, i32) {
    %c0_i32 = arith.constant 0 : i32
    %c0_i32_0 = arith.constant 0 : i32
    %c0_i32_1 = arith.constant 0 : i32
    return %c0_i32, %c0_i32_0 : i32, i32
  }
  func.func @transform_3(%arg0: i32) -> (i32, i32) {
    %c0_i32 = arith.constant 0 : i32
    %c0_i32_0 = arith.constant 0 : i32
    return %arg0, %c0_i32 : i32, i32
  }
}

</mosaic_0001>

<bundles_post_ra>
// kernel: tpu_custom_call.1
= control target key start
LH: loop header
LB: loop body
LE: loop exit
PB: predicated region body
PF: predicated region fallthrough
CT: control target
= control target key end

     0   :  { %8 = vsyncpa [#allocation3], 0  ;;  %s220_s0 = inlined_call_operand.hbm [shape: f32[8,32], index: 0, kind: input, shape index: {}]   ;;  %s221_s1 = inlined_call_operand.hbm [shape: f32[32,64], index: 1, kind: input, shape index: {}]   ;;  %s222_s2 = inlined_call_operand.vmem [shape: f32[1,64], index: 2, kind: input, shape index: {}]   ;;  %s223_s3 = inlined_call_operand.hbm [shape: f32[8,64], index: 3, kind: output, shape index: {}]  }
   0x1   :  { %9 = vsyncpa [#allocation6], 0 }
   0x2   :  { %10 = vsyncpa [#allocation4], 0  ;;  %s16_s14 = sshll.u32 %s220_s0, 4  ;;  %s183_s15 = smov [#allocation2]   ;;  %s17_s14 = int_to_ptr.hbm [resolvable:$true] %s16_s14 }
   0x3   :  { %s18_s16 = sshll.u32 %s183_s15, 4  ;;  %s26_s19 = sshll.u32 %s221_s1, 4  ;;  %s19_s16 = int_to_ptr.vmem [resolvable:$true] %s18_s16  ;;  %s27_s19 = int_to_ptr.hbm [resolvable:$true] %s26_s19 }
   0x4   :  { %21 = dma.hbm_to_vmem [thread:$0]  %s17_s14, 128, %s19_s16, [#allocation3]  }
   0x5   :  { %s184_s20 = smov [#allocation5]   ;;  %s185_s22 = smov 128  }
   0x6   :  { %s28_s21 = sshll.u32 %s184_s20, 4  ;;  %s186_s23 = smov 8   ;;  %s29_s21 = int_to_ptr.vmem [resolvable:$true] %s28_s21 }
   0x7   :  { %34 = dma.hbm_to_vmem [thread:$0]  %s27_s19, 512, %s29_s21, [#allocation6], %s185_s22, %s185_s22, %s186_s23  }
   0x8   :  { %177 = dma.done.wait [#allocation3], 128  }
   0x9   :  { %178 = vsyncadd [#allocation3], 4294967168 }
   0xa   :  { %179 = dma.done.wait [#allocation6], 512  }
   0xb   :  { %180 = vsyncadd [#allocation6], 4294966784  ;;  %v49_v0 = vld [vmem:[#allocation5 + $0x18] sm:$0xff]  ;;  %v48_v1 = vld [vmem:[#allocation5 + $0x10] sm:$0xff]  ;;  %vm54_vm0 = vcmask 261120   ;;  %s187_s24 = smov [#allocation7]  }
   0xc   :  { %70 = vmatpush.msra.mxu0 %v49_v0  ;;  %v47_v2 = vld [vmem:[#allocation5 + $0x8] sm:$0xff]  ;;  %v46_v3 = vld [vmem:[#allocation5] sm:$0xff]  ;;  %v45_v4 = vld [vmem:[#allocation2] sm:$0xff]  ;;  %s85_s25 = sshll.u32 %s187_s24, 4  ;;  %s87_s28 = sshll.u32 %s223_s3, 4  ;;  %vm78_vm1 = vcmask 523264   ;;  %s86_s25 = int_to_ptr.vmem [resolvable:$true] %s85_s25  ;;  %s88_s28 = int_to_ptr.hbm [resolvable:$true] %s87_s28 }
   0xd   :  { %v104_v5 = vld [vmem:[%s222_s2] ss:$0 sm:$0xff] }
   0xe   :  { %71 = vmatpush.msra.mxu0 %v48_v1 }
  0x10   :  { %72 = vmatpush.msra.mxu0 %v47_v2 }
  0x12   :  { %73 = vmatpush.msra.mxu0 %v46_v3 }
  0x13   :  { %98 = vmatmul.msk.f32.vlgmr.msra.gmra.mxu0 %vm54_vm0, %v45_v4 }
  0x90   :  { %v75_v6 = vpop.f32.mrf.mxu0 }
  0x91   :  { %v76_v7 = vadd.f32 %v104_v5, %v75_v6 }
  0x93   :  { %79 = vst.msk [vmem:[#allocation7] sm:$0xff] %vm78_vm1, %v76_v7 }
  0x94   :  { %90 = dma.vmem_to_hbm [thread:$0]  %s86_s25, 128, %s88_s28, [#allocation4]  }
  0x95   :  { %181 = dma.done.wait [#allocation4], 128  }
  0x96   :  { %182 = vsyncadd [#allocation4], 4294967168 }
  0x97   :  { %95 = vsyncpa [#allocation3], 1 }
  0x98   :  { %96 = vsyncpa [#allocation6], 1 }
  0x99   :  { %97 = vsyncpa [#allocation4], 1 }

</bundles_post_ra>
